<compile_context>
chip_gen: v5e
topology: v5e:2x2
jax: 0.10.0
libtpu: 0.0.40
codegen_flags: <defaults>
</compile_context>

<pallas_src>
import math

import jax
import jax.numpy as jnp
from jax.experimental import pallas as pl
from jax.experimental.pallas import tpu as pltpu

_MiB = 1024 * 1024


# ----------------------------------------------------------------------------
# Kernel bodies (pure VPU/EUP elementwise; compute in f32, store in out dtype)
# ----------------------------------------------------------------------------
def _glu_kernel_split(a_ref, g_ref, o_ref):
    # a_ref, g_ref, o_ref: lane-dense VMEM blocks of identical shape.
    a = a_ref[...].astype(jnp.float32)
    g = g_ref[...].astype(jnp.float32)
    o_ref[...] = (a * jax.nn.sigmoid(g)).astype(o_ref.dtype)


def _glu_kernel_fused(x_ref, o_ref):
    # x_ref: (TM, H) full-width block; o_ref: (TM, half).  Fallback path only.
    half = o_ref.shape[-1]
    a = x_ref[:, :half].astype(jnp.float32)
    g = x_ref[:, half:].astype(jnp.float32)
    o_ref[...] = (a * jax.nn.sigmoid(g)).astype(o_ref.dtype)


# ----------------------------------------------------------------------------
# Tiling / budgeting helpers
# ----------------------------------------------------------------------------
def _sublane_pack(dtype) -> int:
    # Rows per packed sublane group: 8 for 32-bit, 16 for 16-bit, 32 for 8-bit.
    return max(8, 32 // jnp.dtype(dtype).itemsize)


def _vmem_budget_and_limit():
    """Generation-aware pipelined-footprint budget and scoped-VMEM limit."""
    try:
        info = pltpu.get_tpu_info()
        cap = getattr(info, "vmem_capacity_bytes", None) or 64 * _MiB
    except Exception:  # no TPU info available -> be conservative (v7x-like)
        cap = 64 * _MiB
    if cap >= 96 * _MiB:          # v5e / v6e: 128 MiB physical VMEM
        budget = 56 * _MiB
    else:                         # v7x: 64 MiB per TensorCore
        budget = 44 * _MiB
    limit = int(min(cap, budget + 8 * _MiB))
    return int(budget), limit


def _choose_tm(n_rows: int, half: int, itemsize: int, pack: int,
               budget: int) -> int:
    """Row tile: pipelined footprint ~= 2 buffers x 3 half-width blocks."""
    if n_rows <= pack:
        return n_rows                      # single full-extent block (exempt)
    tm = budget // (6 * half * itemsize)
    tm = max(pack, min(tm, n_rows))
    # Megacore: aim for >= 4 grid steps when rows allow so both TCs get work.
    if n_rows >= 2 * pack:
        target = -(-(-(-n_rows // 4)) // pack) * pack  # round_up(cdiv(n,4), pack)
        tm = min(tm, max(pack, target))
    tm -= tm % pack
    tm = max(tm, pack)
    return min(tm, n_rows)


# ----------------------------------------------------------------------------
# Last-dim path (the module default, dim = -1)
# ----------------------------------------------------------------------------
def _glu_lastdim(x: jax.Array, budget: int, limit: int) -> jax.Array:
    *lead, H = x.shape
    assert H % 2 == 0, "GLU requires an even split dimension"
    half = H // 2
    n_rows = math.prod(lead) if lead else 1
    x2 = x.reshape(n_rows, H)

    itemsize = x.dtype.itemsize
    pack = _sublane_pack(x.dtype)
    tm = _choose_tm(n_rows, half, itemsize, pack, budget)
    grid = (pl.cdiv(n_rows, tm),)
    cp = pltpu.CompilerParams(dimension_semantics=("parallel",),
                              vmem_limit_bytes=limit)
    out_shape = jax.ShapeDtypeStruct((n_rows, half), x.dtype)

    if half % 128 == 0:
        # Lane-aligned: two half-width streams of the same array.
        out2 = pl.pallas_call(
            _glu_kernel_split,
            out_shape=out_shape,
            grid_spec=pltpu.PrefetchScalarGridSpec(
                num_scalar_prefetch=0,
                grid=grid,
                in_specs=[
                    pl.BlockSpec((tm, half), lambda i: (i, 0)),   # value half
                    pl.BlockSpec((tm, half), lambda i: (i, 1)),   # gate half
                ],
                out_specs=pl.BlockSpec((tm, half), lambda i: (i, 0)),
            ),
            compiler_params=cp,
        )(x2, x2)
    else:
        # Unaligned half: full-width block + in-kernel slice (full-dim exemption).
        # TODO(synk): for large production unaligned widths, pad half up to a
        # multiple of 128 to keep output stores lane-dense.
        out2 = pl.pallas_call(
            _glu_kernel_fused,
            out_shape=out_shape,
            grid_spec=pltpu.PrefetchScalarGridSpec(
                num_scalar_prefetch=0,
                grid=grid,
                in_specs=[pl.BlockSpec((tm, H), lambda i: (i, 0))],
                out_specs=pl.BlockSpec((tm, half), lambda i: (i, 0)),
            ),
            compiler_params=cp,
        )(x2)

    return out2.reshape(*lead, half)


# ----------------------------------------------------------------------------
# Middle-dim path: no transpose — view x as (pre*H, rest) and address halves
# as row-block streams (value = block 2i, gate = block 2i+1).
# ----------------------------------------------------------------------------
def _glu_midaxis(x: jax.Array, dim: int, budget: int, limit: int):
    shape = x.shape
    H = shape[dim]
    half = H // 2
    pre = math.prod(shape[:dim])
    rest = math.prod(shape[dim + 1:])
    itemsize = x.dtype.itemsize

    if half % 8 != 0:
        return None                      # sublane rule would be violated

    # Lane tile over the trailing (rest) axis.
    if 6 * half * rest * itemsize <= budget:
        tr = rest                        # full trailing extent (exempt)
    elif rest % 128 == 0:
        tr = (budget // (6 * half * itemsize)) // 128 * 128
        if tr < 128:
            return None
    else:
        return None

    x2 = x.reshape(pre * H, rest)        # pure view, no data movement
    grid = (pre, pl.cdiv(rest, tr))
    out2 = pl.pallas_call(
        _glu_kernel_split,
        out_shape=jax.ShapeDtypeStruct((pre * half, rest), x.dtype),
        grid_spec=pltpu.PrefetchScalarGridSpec(
            num_scalar_prefetch=0,
            grid=grid,
            in_specs=[
                pl.BlockSpec((half, tr), lambda i, j: (2 * i, j)),      # value
                pl.BlockSpec((half, tr), lambda i, j: (2 * i + 1, j)),  # gate
            ],
            out_specs=pl.BlockSpec((half, tr), lambda i, j: (i, j)),
        ),
        compiler_params=pltpu.CompilerParams(
            dimension_semantics=("parallel", "parallel"),
            vmem_limit_bytes=limit,
        ),
    )(x2, x2)

    return out2.reshape(shape[:dim] + (half,) + shape[dim + 1:])


# ----------------------------------------------------------------------------
# Public wrapper (matches PyTorch GLU.forward)
# ----------------------------------------------------------------------------
def glu(x: jax.Array, dim: int = -1) -> jax.Array:
    """GLU: split `x` in two along `dim`, gate the first half with sigmoid of the second."""
    dim = dim % x.ndim
    assert x.shape[dim] % 2 == 0, "GLU requires an even split dimension"
    budget, limit = _vmem_budget_and_limit()

    if dim != x.ndim - 1:
        out = _glu_midaxis(x, dim, budget, limit)
        if out is not None:
            return out
        # Fallback: transpose to last dim (extra HBM pass; only when unavoidable).
        x_moved = jnp.moveaxis(x, dim, -1)
        out = _glu_lastdim(x_moved, budget, limit)
        return jnp.moveaxis(out, -1, dim)

    return _glu_lastdim(x, budget, limit)


def glu_ref(x: jax.Array, dim: int = -1) -> jax.Array:
    a, g = jnp.split(x, 2, axis=dim)
    return a * jax.nn.sigmoid(g)


if __name__ == "__main__":
    key = jax.random.PRNGKey(0)
    k1, k2, k3 = jax.random.split(key, 3)

    # 1) Last dim, non-lane-aligned half (= 32) -> fused fallback path.
    x_small = jax.random.normal(k1, (2, 8, 64), dtype=jnp.float32)
    out_small = jax.block_until_ready(glu(x_small))
    assert out_small.shape == (2, 8, 32)
    assert jnp.allclose(out_small, glu_ref(x_small), atol=1e-5, rtol=1e-5)

    # 2) Last dim, lane-aligned half (= 128) -> two-stream half-width path.
    x_aligned = jax.random.normal(k2, (2, 16, 256), dtype=jnp.float32)
    out_aligned = jax.block_until_ready(glu(x_aligned))
    assert out_aligned.shape == (2, 16, 128)
    assert jnp.allclose(out_aligned, glu_ref(x_aligned), atol=1e-5, rtol=1e-5)

    # 3) Middle dim (dim=1) -> transpose-free row-block-stream path.
    x_mid = jax.random.normal(k3, (2, 16, 128), dtype=jnp.float32)
    out_mid = jax.block_until_ready(glu(x_mid, dim=1))
    assert out_mid.shape == (2, 8, 128)
    assert jnp.allclose(out_mid, glu_ref(x_mid, dim=1), atol=1e-5, rtol=1e-5)

    print("KERNEL_OK")
</pallas_src>

<mosaic_0001>
module attributes {stable_mosaic.version = 11 : i64} {
  func.func @_glu_kernel_fused(%arg0: i32, %arg1: memref<8x64xf32, #tpu.memory_space<vmem>>, %arg2: memref<8x32xf32, #tpu.memory_space<vmem>>) attributes {dimension_semantics = [#tpu.dimension_semantics<parallel>], iteration_bounds = array<i64: 2>, scalar_prefetch = 0 : i64, scratch_operands = 0 : i64, tpu.core_type = #tpu.core_type<tc>, window_params = [{transform_indices = @transform_0, window_bounds = array<i64: 8, 64>}, {transform_indices = @transform_1, window_bounds = array<i64: 8, 32>}]} {
    %c0 = arith.constant 0 : index
    %c0_0 = arith.constant 0 : index
    %0 = vector.load %arg1[%c0, %c0_0] : memref<8x64xf32, #tpu.memory_space<vmem>>, vector<8x32xf32>
    %c0_1 = arith.constant 0 : index
    %c32 = arith.constant 32 : index
    %1 = vector.load %arg1[%c0_1, %c32] : memref<8x64xf32, #tpu.memory_space<vmem>>, vector<8x32xf32>
    %2 = arith.negf %1 : vector<8x32xf32>
    %3 = math.exp %2 : vector<8x32xf32>
    %cst = arith.constant 1.000000e+00 : f32
    %4 = vector.broadcast %cst : f32 to vector<8x32xf32>
    %5 = arith.addf %4, %3 : vector<8x32xf32>
    %6 = arith.divf %4, %5 : vector<8x32xf32>
    %7 = arith.mulf %0, %6 : vector<8x32xf32>
    %c0_2 = arith.constant 0 : index
    %c0_3 = arith.constant 0 : index
    %8 = vector.load %arg2[%c0_2, %c0_3] : memref<8x32xf32, #tpu.memory_space<vmem>>, vector<8x32xf32>
    tpu.vector_store %arg2[%c0_2, %c0_3], %7 {strides = array<i32>} : memref<8x32xf32, #tpu.memory_space<vmem>>, vector<8x32xf32>,
    return
  }
  func.func @transform_0(%arg0: i32) -> (i32, i32) {
    %c0_i32 = arith.constant 0 : i32
    %c0_i32_0 = arith.constant 0 : i32
    return %arg0, %c0_i32 : i32, i32
  }
  func.func @transform_1(%arg0: i32) -> (i32, i32) {
    %c0_i32 = arith.constant 0 : i32
    %c0_i32_0 = arith.constant 0 : i32
    return %arg0, %c0_i32 : i32, i32
  }
}

</mosaic_0001>

<bundles_post_ra>
// kernel: tpu_custom_call.1
= control target key start
LH: loop header
LB: loop body
LE: loop exit
PB: predicated region body
PF: predicated region fallthrough
CT: control target
= control target key end

     0   :  { %6 = vsyncpa [#allocation3], 0  ;;  %s551_s0 = inlined_call_operand.hbm [shape: f32[16,64], index: 0, kind: input, shape index: {}]   ;;  %s552_s1 = inlined_call_operand.hbm [shape: f32[16,32], index: 1, kind: output, shape index: {}]  }
   0x1   :  { %8 = vsyncpa [#allocation3 + $0x1], 0 }
   0x2   :  { %9 = vsyncpa [#allocation4], 0 }
   0x3   :  { %11 = vsyncpa [#allocation4 + $0x1], 0  ;;  %s420_s6 = smov 0   ;;  %s422_s7 = smov 0  }
   0x4   :  { %s424_s8 = smov 0   ;;  %s426_s9 = smov 0  }
   0x5 LB: > { %s441_s10 = sadd.s32 4294967295, %s407_s9   ;;  %s247_s11 = sadd.s32 4294967294, %s407_s9   ;;  %s407_s9 = sphi %s426_s9, %s562_s9   ;;  %s403_s8 = sphi %s424_s8, %s561_s8   ;;  %s399_s7 = sphi %s422_s7, %s560_s7   ;;  %s395_s6 = sphi %s420_s6, %s559_s6  }
   0x6   : > { %s445_s12 = sadd.s32 1, %s407_s9   ;;  %s24_s13 = sadd.s32 1, %s403_s8 }
   0x7   : > { %s21_s14 = ssub.s32 %s407_s9, %s445_s12  ;;  %p31_p0 = scmp.ne.s32.totalorder %s403_s8, %s399_s7 }
   0x8   : > { %p22_p1 = scmp.eq.s32.totalorder %s21_s14, 0  ;;  %p32_p2 = scmp.eq.s32.totalorder %s407_s9, 0 }
   0x9   : > { %p37_p3 = scmp.ne.s32.totalorder %s399_s7, %s395_s6  ;;  %p38_p4 = scmp.eq.s32.totalorder %s441_s10, 0 }
   0xa   : > { %s457_s15 = scalar_select %p22_p1, %s403_s8, %s24_s13  }
   0xb   : > { %p459_p5 = por %p32_p2, %p31_p0  ;;  %p463_p6 = por %p38_p4, %p37_p3 }
   0xc   : > { %p61_p7 = scmp.eq.s32.totalorder %s441_s10, 1  ;;  %p67_p8 = scmp.eq.s32.totalorder %s247_s11, 1 }
   0xd   : > { %p272_p10 = scmp.lt.s32.totalorder %s407_s9, 2  ;;  %s87_s20 = sand.u32 1, %s403_s8  }
   0xe   : > { %p470_p11 = por %p61_p7, %p31_p0  ;;  %p474_p12 = por %p67_p8, %p37_p3 }
   0xf   : > { %s251_s21 = sshll.u32 %s407_s9, 3  ;;  %s250_s22 = sshll.u32 %s87_s20, 3 }
  0x10   : > { %s95_s25 = scalar_lea.hbm %s551_s0, %s251_s21  ;;  %s91_s27 = scalar_lea.vmem [#allocation2], %s250_s22 }
  0x11   : > { %s97_s26 = sshll.u32 %s95_s25, 4  ;;  %s99_s28 = sshll.u32 %s91_s27, 4  ;;  %s98_s26 = int_to_ptr.hbm [resolvable:$true] %s97_s26  ;;  %s100_s28 = int_to_ptr.vmem [resolvable:$true] %s99_s28 }
  0x12   : > { %p485_p13 = pnand %p272_p10, %p459_p5  ;;  %p252_p0 = scmp.ge.s32.totalorder %s407_s9, 1 }
  0x13   : > { %p104_p1 = scmp.lt.s32.totalorder %s407_s9, 3  ;;  %s88_s30 = scalar_lea.sflag [#allocation3], %s87_s20 }
  0x14   : > { %s311_s2 = sshra.s32 %s98_s26, 4  ;;  %p315_p3 = pneg %p485_p13  ;;  %s312_s2 = int_to_ptr.hbm [resolvable:$true] %s311_s2 }
  0x15   : > { %s313_s3 = scalar_lea.hbm %s312_s2, 8  ;;  %s318_s11 = scalar_lea.hbm %s551_s0, 16 }
  0x16   : > { %p314_p2 = scmp.ne.s32.totalorder %s312_s2, %s313_s3  ;;  %p319_p5 = scmp.lt.s32.totalorder %s312_s2, %s551_s0 }
  0x17   : > { %p320_p8 = scmp.lt.s32.totalorder %s318_s11, %s313_s3 }
  0x18   : > { %p316_p4 = pnand %p315_p3, %p314_p2 }
  0x19   : > { %p321_p10 = por %p320_p8, %p319_p5 }
  0x1a   : > { %p317_p7 = pneg %p316_p4 }
  0x1c   : > { %p322_p9 = pnand %p321_p10, %p317_p7 }
  0x1e   : > { %325 = shalt.err (!%p322_p9)
}
  0x1f   : > { %267 = dma.hbm_to_vmem [thread:$0]  (!%p485_p13), %s98_s26, 128, %s100_s28, %s88_s30  }
  0x20   : > { %p105_p2 = pnand %p252_p0, %p104_p1 }
  0x21   : > { %s506_s16 = sand.u32 (!%p105_p2), 1, %s399_s7  }
  0x22   : > { %108 = sbr.rel (%p105_p2) target bundleno = 189 (0xbd), region = 24  ;;  %s253_s20 = sshll.u32 (!%p105_p2), %s506_s16, 3 }
  0x23   : > { %s111_s21 = scalar_lea.sflag (!%p105_p2), [#allocation3], %s506_s16  ;;  %s114_s22 = scalar_lea.vmem (!%p105_p2), [#allocation2], %s253_s20 }
  0x27   : > { %386 = dma.done.wait (%p463_p6), %s111_s21, 128  }
  0x28   : > { %388 = vsyncadd (%p463_p6), %s111_s21, 4294967168  ;;  %v134_v0 = vld [vmem:[%s114_s22] sm:$0xff]  ;;  %s409_s17 = smov 96   ;;  %s257_s23 = sshll.u32 %s441_s10, 3  ;;  %vm159_vm4 = vcmask 261120  }
  0x29   : > { %v255_v1 = vmul.f32 -1.442695, %v134_v0  ;;  %s172_s26 = scalar_lea.hbm %s552_s1, %s257_s23  ;;  %s133_s27 = scalar_lea.vmem [#allocation5], %s253_s20 }
  0x2a   : > { %s174_s28 = sshll.u32 %s133_s27, 4  ;;  %s176_s29 = sshll.u32 %s172_s26, 4  ;;  %s175_s28 = int_to_ptr.vmem [resolvable:$true] %s174_s28  ;;  %s177_s29 = int_to_ptr.hbm [resolvable:$true] %s176_s29 }
  0x2b   : > { %307 = vpow2.f32 %v255_v1  ;;  %s162_s30 = scalar_lea.sflag [#allocation4], %s506_s16  ;;  %s355_s2 = sshra.s32 %s177_s29, 4  ;;  %s356_s2 = int_to_ptr.hbm [resolvable:$true] %s355_s2 }
  0x2c   : > { %s357_s3 = scalar_lea.hbm %s356_s2, 8  ;;  %s361_s5 = scalar_lea.hbm %s552_s1, 16 }
  0x2d   : > { %p358_p6 = scmp.ne.s32.totalorder %s356_s2, %s357_s3  ;;  %p362_p0 = scmp.lt.s32.totalorder %s356_s2, %s552_s1 }
  0x2e   : > { %p363_p1 = scmp.lt.s32.totalorder %s361_s5, %s357_s3 }
  0x2f   : > { %p359_p9 = pnand %p358_p6, %p470_p11 }
  0x30   : > { %p364_p3 = por %p363_p1, %p362_p0 }
  0x31   : > { %v308_v2 = vpop.eup %307  ;;  %p360_p13 = pneg %p359_p9 }
  0x32   : > { %v138_v3 = vadd.f32 1.0, %v308_v2 }
  0x33   : > { %p365_p4 = pnand %p364_p3, %p360_p13 }
  0x34   : > { %309 = vrcp.f32 %v138_v3  ;;  %v150_v6 = vand.u32 2147483648, %v138_v3  ;;  %vm144_vm0 = vweird.f32 %v138_v3  ;;  %v148_v8 = vand.u32 2147483647, %v138_v3 }
  0x36   : > { %v151_v10 = vor.u32 1.1754944e-38, %v150_v6  ;;  %vm149_vm3 = vcmp.eq.f32.partialorder %v148_v8, 8.507059e+37 }
  0x3a   : > { %v310_v4 = vpop.eup %309 }
  0x3b   : > { %v140_v5 = vmul.f32 %v310_v4, %v138_v3  ;;  %vm145_vm1 = vweird.f32 %v310_v4 }
  0x3c   : > { %vm146_vm2 = vmor %vm144_vm0, %vm145_vm1 }
  0x3d   : > { %v141_v7 = vsub.f32 1.0, %v140_v5 }
  0x3f   : > { %v142_v9 = vmul.f32 %v310_v4, %v141_v7 }
  0x41   : > { %v143_v11 = vadd.f32 %v310_v4, %v142_v9 }
  0x43   : > { %v147_v12 = vsel %vm146_vm2, %v310_v4, %v143_v11 }
  0x44   : > { %v152_v13 = vsel %vm149_vm3, %v151_v10, %v147_v12 }
  0x45   : > { %155 = vrot.lane.b32.xlu0 %v152_v13, %s409_s17 }
  0xb7   : > { %v156_v14 = vpop.permute.xlu0 %155 }
  0xb8   : > { %v158_v15 = vmul.f32 %v156_v14, %v134_v0 }
  0xba   : > { %160 = vst.msk [vmem:[%s133_s27] sm:$0xff] %vm159_vm4, %v158_v15 }
  0xbb   : > { %368 = shalt.err (!%p365_p4)
}
  0xbc   : > { %262 = dma.vmem_to_hbm [thread:$0]  (%p470_p11), %s175_s28, 128, %s177_s29, %s162_s30  }
  0xbd PF: > { %s188_s14 = sand.u32 1, %s395_s6   ;;  %p558_p7 = scmp.ge.s32.totalorder %s407_s9, 2 }
  0xbe   : > { %s189_s16 = scalar_lea.sflag [#allocation4], %s188_s14 }
  0xbf   : > { %p269_p5 = pnand %p558_p7, %p474_p12 }
  0xc1   : > { %p270_p8 = pneg %p269_p5 }
  0xc3   : > { %390 = dma.done.wait (%p270_p8), %s189_s16, 128  }
  0xc4   : > { %392 = vsyncadd (%p270_p8), %s189_s16, 4294967168  ;;  %p14_p10 = scmp.ge.s32.totalorder %s445_s12, 4   ;;  %s559_s6 = smov %s399_s7 }
  0xc5   : > { %s560_s7 = smov %s403_s8  ;;  %s561_s8 = smov %s457_s15 }
  0xc6   : > { %s562_s9 = smov %s445_s12  ;;  %16 = sbr.rel (!%p14_p10) target bundleno = 5 (0x5), region = 69 }
  0xcb   :  { %195 = vsyncpa [#allocation3], 1 }
  0xcc   :  { %197 = vsyncpa [#allocation3 + $0x1], 1 }
  0xcd   :  { %198 = vsyncpa [#allocation4], 1 }
  0xce   :  { %200 = vsyncpa [#allocation4 + $0x1], 1 }

</bundles_post_ra>
